<compile_context>
chip_gen: v7x
topology: tpu7x:2x2x1
jax: 0.10.0
libtpu: 0.0.40
codegen_flags: <defaults>
</compile_context>

<pallas_src>
import jax
import jax.numpy as jnp
from jax.experimental import pallas as pl
from jax.experimental.pallas import tpu as pltpu

IN_DIM = 600
HIDDEN = 128
OUT_DIM = 100

TILE_B_DEFAULT = 2048                 # amortizes per-step overhead, fits all gens
VMEM_LIMIT_BYTES = 32 * 1024 * 1024   # explicit scoped-VMEM budget (safe on v5e..v7x)


def _round_up(n, m):
    return (n + m - 1) // m * m


def mlp_kernel(x_ref, w1_ref, b1_ref, w2_ref, b2_ref, o_ref):
    # Layer 1: cast activations to bf16 in-kernel (fused; no wrapper pre-pass),
    # bf16 x bf16 -> f32 on the MXU, bias + tanh in f32 (VPU/EUP).
    x = x_ref[...].astype(jnp.bfloat16)                      # (tb, 600)
    h = jnp.dot(x, w1_ref[...], preferred_element_type=jnp.float32)
    h = jnp.tanh(h + b1_ref[...])                            # (tb,128) + (1,128)
    # Layer 2: bf16 activations, f32 accumulation; store at final 100-wide.
    out = jnp.dot(h.astype(jnp.bfloat16), w2_ref[...],
                  preferred_element_type=jnp.float32)        # (tb, 100)
    o_ref[...] = (out + b2_ref[...]).astype(o_ref.dtype)


def mlp_forward(x, w1, b1, w2, b2, *, tile_b=TILE_B_DEFAULT):
    """Fused MLP forward.

    x:  (B, 600)
    w1: (600, 128), b1: (128,)   -- (in, out) layout (transpose of PyTorch)
    w2: (128, 100), b2: (100,)
    returns (B, 100) in x.dtype

    Note: intentionally uses bf16 matmul inputs with f32 accumulation (small
    precision loss vs a pure-f32 PyTorch forward; within ~1e-2).
    """
    B = x.shape[0]
    out_dtype = x.dtype

    # Batch tile: multiple of 16 (bf16 sublane packing), capped at tile_b.
    tb = min(tile_b, _round_up(max(B, 16), 16))
    B_pad = _round_up(B, tb)

    # Only the batch axis is ever padded (and only when needed); the 600-wide K
    # and 100-wide N dims are streamed unpadded straight into the kernel.
    x_p = x if B_pad == B else jnp.pad(x, ((0, B_pad - B), (0, 0)))

    # One-time tiny casts of the (~90K param) weights; biases stay f32.
    w1_p = w1.astype(jnp.bfloat16)                        # (600, 128)
    b1_p = b1.reshape(1, HIDDEN).astype(jnp.float32)
    w2_p = w2.astype(jnp.bfloat16)                        # (128, 100)
    b2_p = b2.reshape(1, OUT_DIM).astype(jnp.float32)

    grid = (B_pad // tb,)

    out = pl.pallas_call(
        mlp_kernel,
        out_shape=jax.ShapeDtypeStruct((B_pad, OUT_DIM), out_dtype),
        grid_spec=pltpu.PrefetchScalarGridSpec(
            num_scalar_prefetch=0,
            grid=grid,
            in_specs=[
                # Streamed activations: a new batch tile each grid step.
                pl.BlockSpec((tb, IN_DIM), lambda i: (i, 0)),
                # Weights / biases: constant block index -> fetched once and
                # kept VMEM-resident across all grid steps.
                # TODO(synk): pipeline_mode=pl.Buffered(1) would halve their
                # (tiny, ~0.2 MiB) double-buffer footprint if supported.
                pl.BlockSpec((IN_DIM, HIDDEN), lambda i: (0, 0)),
                pl.BlockSpec((1, HIDDEN), lambda i: (0, 0)),
                pl.BlockSpec((HIDDEN, OUT_DIM), lambda i: (0, 0)),
                pl.BlockSpec((1, OUT_DIM), lambda i: (0, 0)),
            ],
            out_specs=pl.BlockSpec((tb, OUT_DIM), lambda i: (i, 0)),
        ),
        compiler_params=pltpu.CompilerParams(
            dimension_semantics=("parallel",),      # batch axis -> megacore split
            vmem_limit_bytes=VMEM_LIMIT_BYTES,
        ),
    )(x_p, w1_p, b1_p, w2_p, b2_p)

    # No post-kernel cast / column slice; only strip batch padding if any.
    return out if B_pad == B else out[:B]


def init_params(key):
    """Deterministic init matching nn.Linear's default U(-1/sqrt(fan_in), +1/sqrt(fan_in))."""
    k1, k2, k3, k4 = jax.random.split(key, 4)
    bound1 = 1.0 / jnp.sqrt(jnp.float32(IN_DIM))
    bound2 = 1.0 / jnp.sqrt(jnp.float32(HIDDEN))
    # Stored as (in, out) so the kernel does x @ W (PyTorch stores (out, in)).
    w1 = jax.random.uniform(k1, (IN_DIM, HIDDEN), jnp.float32, -bound1, bound1)
    b1 = jax.random.uniform(k2, (HIDDEN,), jnp.float32, -bound1, bound1)
    w2 = jax.random.uniform(k3, (HIDDEN, OUT_DIM), jnp.float32, -bound2, bound2)
    b2 = jax.random.uniform(k4, (OUT_DIM,), jnp.float32, -bound2, bound2)
    return w1, b1, w2, b2


def mlp_reference(x, w1, b1, w2, b2):
    """Pure-JAX reference emulating the kernel's bf16-input / f32-accumulate math."""
    xb = x.astype(jnp.bfloat16).astype(jnp.float32)
    w1b = w1.astype(jnp.bfloat16).astype(jnp.float32)
    w2b = w2.astype(jnp.bfloat16).astype(jnp.float32)
    h = jnp.tanh(xb @ w1b + b1.reshape(1, -1))
    hb = h.astype(jnp.bfloat16).astype(jnp.float32)
    return hb @ w2b + b2.reshape(1, -1)


if __name__ == "__main__":
    key = jax.random.PRNGKey(0)
    kx1, kx2, kp = jax.random.split(key, 3)
    w1, b1, w2, b2 = init_params(kp)

    fwd = jax.jit(mlp_forward, static_argnames="tile_b")

    # Case 1: small batch, B a multiple of 16 -> zero wrapper-side copies.
    B1 = 16
    x1 = jax.random.normal(kx1, (B1, IN_DIM), jnp.float32)
    out1 = fwd(x1, w1, b1, w2, b2)
    jax.block_until_ready(out1)
    ref1 = mlp_reference(x1, w1, b1, w2, b2)
    assert out1.shape == (B1, OUT_DIM)
    assert jnp.allclose(out1, ref1, atol=1e-2, rtol=1e-2), \
        f"max err {jnp.max(jnp.abs(out1 - ref1))}"

    # Case 2: ragged batch with a small tile to exercise the grid and the
    # batch-padding path (pads 40 -> 48 rows, grid=(3,)).
    B2 = 40
    x2 = jax.random.normal(kx2, (B2, IN_DIM), jnp.float32)
    out2 = fwd(x2, w1, b1, w2, b2, tile_b=16)
    jax.block_until_ready(out2)
    ref2 = mlp_reference(x2, w1, b1, w2, b2)
    assert out2.shape == (B2, OUT_DIM)
    assert jnp.allclose(out2, ref2, atol=1e-2, rtol=1e-2), \
        f"max err {jnp.max(jnp.abs(out2 - ref2))}"

    print("KERNEL_OK")
</pallas_src>

<mosaic_0001>
module attributes {stable_mosaic.version = 11 : i64} {
  func.func @mlp_kernel(%arg0: i32, %arg1: memref<16x600xf32, #tpu.memory_space<vmem>>, %arg2: memref<600x128xbf16, #tpu.memory_space<vmem>>, %arg3: memref<1x128xf32, #tpu.memory_space<vmem>>, %arg4: memref<128x100xbf16, #tpu.memory_space<vmem>>, %arg5: memref<1x100xf32, #tpu.memory_space<vmem>>, %arg6: memref<16x100xf32, #tpu.memory_space<vmem>>) attributes {dimension_semantics = [#tpu.dimension_semantics<parallel>], iteration_bounds = array<i64: 1>, scalar_prefetch = 0 : i64, scratch_operands = 0 : i64, tpu.core_type = #tpu.core_type<tc>, window_params = [{transform_indices = @transform_0, window_bounds = array<i64: 16, 600>}, {pipeline_mode = #tpu.pipeline_mode<synchronous>, transform_indices = @transform_1, window_bounds = array<i64: 600, 128>}, {pipeline_mode = #tpu.pipeline_mode<synchronous>, transform_indices = @transform_2, window_bounds = array<i64: 1, 128>}, {pipeline_mode = #tpu.pipeline_mode<synchronous>, transform_indices = @transform_3, window_bounds = array<i64: 128, 100>}, {pipeline_mode = #tpu.pipeline_mode<synchronous>, transform_indices = @transform_4, window_bounds = array<i64: 1, 100>}, {transform_indices = @transform_5, window_bounds = array<i64: 16, 100>}]} {
    %c0 = arith.constant 0 : index
    %c0_0 = arith.constant 0 : index
    %0 = vector.load %arg1[%c0, %c0_0] : memref<16x600xf32, #tpu.memory_space<vmem>>, vector<16x600xf32>
    %1 = arith.truncf %0 : vector<16x600xf32> to vector<16x600xbf16>
    %c0_1 = arith.constant 0 : index
    %c0_2 = arith.constant 0 : index
    %2 = vector.load %arg2[%c0_1, %c0_2] : memref<600x128xbf16, #tpu.memory_space<vmem>>, vector<600x128xbf16>
    %cst = arith.constant dense<0.000000e+00> : vector<16x128xf32>
    %3 = tpu.matmul %1, %2, %cst {dimension_numbers = #tpu.dot_dimension_numbers<[1], [0], [0], [1], [0, 0, 1, 1], [], []>} : vector<16x600xbf16>, vector<600x128xbf16>, vector<16x128xf32> -> vector<16x128xf32>
    %c0_3 = arith.constant 0 : index
    %c0_4 = arith.constant 0 : index
    %4 = vector.load %arg3[%c0_3, %c0_4] : memref<1x128xf32, #tpu.memory_space<vmem>>, vector<1x128xf32>
    %5 = vector.broadcast %4 : vector<1x128xf32> to vector<16x128xf32>
    %6 = arith.addf %3, %5 : vector<16x128xf32>
    %7 = math.tanh %6 : vector<16x128xf32>
    %8 = arith.truncf %7 : vector<16x128xf32> to vector<16x128xbf16>
    %c0_5 = arith.constant 0 : index
    %c0_6 = arith.constant 0 : index
    %9 = vector.load %arg4[%c0_5, %c0_6] : memref<128x100xbf16, #tpu.memory_space<vmem>>, vector<128x100xbf16>
    %cst_7 = arith.constant dense<0.000000e+00> : vector<16x100xf32>
    %10 = tpu.matmul %8, %9, %cst_7 {dimension_numbers = #tpu.dot_dimension_numbers<[1], [0], [0], [1], [0, 0, 1, 1], [], []>} : vector<16x128xbf16>, vector<128x100xbf16>, vector<16x100xf32> -> vector<16x100xf32>
    %c0_8 = arith.constant 0 : index
    %c0_9 = arith.constant 0 : index
    %11 = vector.load %arg5[%c0_8, %c0_9] : memref<1x100xf32, #tpu.memory_space<vmem>>, vector<1x100xf32>
    %12 = vector.broadcast %11 : vector<1x100xf32> to vector<16x100xf32>
    %13 = arith.addf %10, %12 : vector<16x100xf32>
    %c0_10 = arith.constant 0 : index
    %c0_11 = arith.constant 0 : index
    %14 = vector.load %arg6[%c0_10, %c0_11] : memref<16x100xf32, #tpu.memory_space<vmem>>, vector<16x100xf32>
    tpu.vector_store %arg6[%c0_10, %c0_11], %13 {strides = array<i32>} : memref<16x100xf32, #tpu.memory_space<vmem>>, vector<16x100xf32>,
    return
  }
  func.func @transform_0(%arg0: i32) -> (i32, i32) {
    %c0_i32 = arith.constant 0 : i32
    %c0_i32_0 = arith.constant 0 : i32
    return %arg0, %c0_i32 : i32, i32
  }
  func.func @transform_1(%arg0: i32) -> (i32, i32) {
    %c0_i32 = arith.constant 0 : i32
    %c0_i32_0 = arith.constant 0 : i32
    %c0_i32_1 = arith.constant 0 : i32
    return %c0_i32, %c0_i32_0 : i32, i32
  }
  func.func @transform_2(%arg0: i32) -> (i32, i32) {
    %c0_i32 = arith.constant 0 : i32
    %c0_i32_0 = arith.constant 0 : i32
    %c0_i32_1 = arith.constant 0 : i32
    return %c0_i32, %c0_i32_0 : i32, i32
  }
  func.func @transform_3(%arg0: i32) -> (i32, i32) {
    %c0_i32 = arith.constant 0 : i32
    %c0_i32_0 = arith.constant 0 : i32
    %c0_i32_1 = arith.constant 0 : i32
    return %c0_i32, %c0_i32_0 : i32, i32
  }
  func.func @transform_4(%arg0: i32) -> (i32, i32) {
    %c0_i32 = arith.constant 0 : i32
    %c0_i32_0 = arith.constant 0 : i32
    %c0_i32_1 = arith.constant 0 : i32
    return %c0_i32, %c0_i32_0 : i32, i32
  }
  func.func @transform_5(%arg0: i32) -> (i32, i32) {
    %c0_i32 = arith.constant 0 : i32
    %c0_i32_0 = arith.constant 0 : i32
    return %arg0, %c0_i32 : i32, i32
  }
}

</mosaic_0001>

<bundles_post_ra>
// kernel: mlp_forward.1
= control target key start
LH: loop header
LB: loop body
LE: loop exit
PB: predicated region body
PF: predicated region fallthrough
CT: control target
= control target key end

     0   :  { %v833_v36 = vmov 0.0   ;;  %vm834_vm0 = vmmov 0   ;;  %s1070_s0 = inlined_call_operand.vmem [shape: f32[16,600], index: 0, kind: input, shape index: {}]   ;;  %s1071_s1 = inlined_call_operand.vmem [shape: bf16[600,128], index: 1, kind: input, shape index: {}]   ;;  %s1072_s2 = inlined_call_operand.vmem [shape: f32[1,128], index: 2, kind: input, shape index: {}]   ;;  %s1073_s3 = inlined_call_operand.vmem [shape: bf16[128,100], index: 3, kind: input, shape index: {}]   ;;  %s1074_s4 = inlined_call_operand.vmem [shape: f32[1,100], index: 4, kind: input, shape index: {}]   ;;  %s1075_s5 = inlined_call_operand.hbm [shape: f32[16,100], index: 5, kind: output, shape index: {}]  }
   0x1   :  { %v759_v0 = vld [vmem:[%s1071_s1 + $0x40] sm:$0xff]   ;;  %v763_v4 = vld [vmem:[%s1071_s1 + $0x48] sm:$0xff]   ;;  %v767_v8 = vld [vmem:[%s1071_s1 + $0x50] sm:$0xff]  }
   0x2   :  { %v760_v1 = vld [vmem:[%s1071_s1] sm:$0xff]   ;;  %658 = vmatprep.subr.bf16.mxu0 %v759_v0  ;;  %v764_v5 = vld [vmem:[%s1071_s1 + $0x8] sm:$0xff]   ;;  %v768_v9 = vld [vmem:[%s1071_s1 + $0x10] sm:$0xff]  }
   0x3   :  { %v761_v2 = vld [vmem:[%s1071_s1 + $0xc0] sm:$0xff]   ;;  %659 = vmatpush3.bf16.msra.mxu0 %v760_v1  ;;  %v765_v6 = vld [vmem:[%s1071_s1 + $0xc8] sm:$0xff]   ;;  %v769_v10 = vld [vmem:[%s1071_s1 + $0xd0] sm:$0xff]  }
   0x4   :  { %v762_v3 = vld [vmem:[%s1071_s1 + $0x80] sm:$0xff]   ;;  %680 = vmatprep.subr.bf16.mxu1 %v761_v2  ;;  %660 = vmatprep.subr.bf16.mxu0 %v763_v4  ;;  %v766_v7 = vld [vmem:[%s1071_s1 + $0x88] sm:$0xff]   ;;  %v770_v11 = vld [vmem:[%s1071_s1 + $0x90] sm:$0xff]  }
   0x5   :  { %681 = vmatpush3.bf16.msra.mxu1 %v762_v3  ;;  %v771_v12 = vld [vmem:[%s1071_s1 + $0x58] sm:$0xff]   ;;  %v775_v16 = vld [vmem:[%s1071_s1 + $0x60] sm:$0xff]   ;;  %v779_v20 = vld [vmem:[%s1071_s1 + $0x68] sm:$0xff]  }
   0x6   :  { %682 = vmatprep.subr.bf16.mxu1 %v765_v6  ;;  %v772_v13 = vld [vmem:[%s1071_s1 + $0x18] sm:$0xff]   ;;  %v776_v17 = vld [vmem:[%s1071_s1 + $0x20] sm:$0xff]   ;;  %v780_v21 = vld [vmem:[%s1071_s1 + $0x28] sm:$0xff]  }
   0x7   :  { %661 = vmatpush3.bf16.msra.mxu0 %v764_v5  ;;  %v773_v14 = vld [vmem:[%s1071_s1 + $0xd8] sm:$0xff]   ;;  %v777_v18 = vld [vmem:[%s1071_s1 + $0xe0] sm:$0xff]   ;;  %v781_v22 = vld [vmem:[%s1071_s1 + $0xe8] sm:$0xff]  }
   0x8   :  { %662 = vmatprep.subr.bf16.mxu0 %v767_v8  ;;  %v774_v15 = vld [vmem:[%s1071_s1 + $0x98] sm:$0xff]   ;;  %v778_v19 = vld [vmem:[%s1071_s1 + $0xa0] sm:$0xff]   ;;  %v782_v23 = vld [vmem:[%s1071_s1 + $0xa8] sm:$0xff]  }
   0x9   :  { %683 = vmatpush3.bf16.msra.mxu1 %v766_v7  ;;  %v783_v24 = vld [vmem:[%s1071_s1 + $0x70] sm:$0xff]   ;;  %v787_v28 = vld [vmem:[%s1071_s1 + $0x78] sm:$0xff]   ;;  %v23_v31 = vld [vmem:[%s1070_s0 + $0x8] sm:$0xff] }
   0xa   :  { %684 = vmatprep.subr.bf16.mxu1 %v769_v10  ;;  %v784_v25 = vld [vmem:[%s1071_s1 + $0x30] sm:$0xff]   ;;  %v788_v29 = vld [vmem:[%s1071_s1 + $0x38] sm:$0xff]   ;;  %v22_v35 = vld [vmem:[%s1070_s0] sm:$0xff] }
   0xb   :  { %663 = vmatpush3.bf16.msra.mxu0 %v768_v9  ;;  %v785_v26 = vld [vmem:[%s1071_s1 + $0xf0] sm:$0xff]   ;;  %v789_v30 = vld [vmem:[%s1071_s1 + $0xf8] sm:$0xff]   ;;  %v27_v37 = vld [vmem:[%s1070_s0 + $0x28] sm:$0xff] }
   0xc   :  { %664 = vmatprep.subr.bf16.mxu0 %v771_v12  ;;  %v786_v27 = vld [vmem:[%s1071_s1 + $0xb0] sm:$0xff]   ;;  %v790_v34 = vld [vmem:[%s1071_s1 + $0xb8] sm:$0xff]   ;;  %v30_v39 = vld [vmem:[%s1070_s0 + $0x40] sm:$0xff]  ;;  %v32_v40 = vpack.c.bf16 %v27_v37, %v22_v35 }
   0xd   :  { %685 = vmatpush3.bf16.msra.mxu1 %v770_v11  ;;  %v28_v32 = vld [vmem:[%s1070_s0 + $0x30] sm:$0xff]  ;;  %v25_v38 = vld [vmem:[%s1070_s0 + $0x18] sm:$0xff]  ;;  %v791_v42 = vld [vmem:[%s1071_s1 + $0x100] sm:$0xff]  }
   0xe   :  { %686 = vmatprep.subr.bf16.mxu1 %v773_v14  ;;  %v33_v33 = vpack.c.bf16 %v28_v32, %v23_v31  ;;  %v35_v41 = vpack.c.bf16 %v30_v39, %v25_v38  ;;  %v24_v43 = vld [vmem:[%s1070_s0 + $0x10] sm:$0xff]  ;;  %v29_v44 = vld [vmem:[%s1070_s0 + $0x38] sm:$0xff]  ;;  %v792_v46 = vld [vmem:[%s1071_s1 + $0x108] sm:$0xff]  }
   0xf   :  { %665 = vmatpush3.bf16.msra.mxu0 %v772_v13  ;;  %v34_v45 = vpack.c.bf16 %v29_v44, %v24_v43  ;;  %v793_v47 = vld [vmem:[%s1071_s1 + $0x110] sm:$0xff]   ;;  %v794_v48 = vld [vmem:[%s1071_s1 + $0x118] sm:$0xff]  }
  0x10   :  { %666 = vmatprep.subr.bf16.mxu0 %v775_v16  ;;  %384 = vmatprep.mubr.bf16.mxu0 %v33_v33 }
  0x11   :  { %687 = vmatpush3.bf16.msra.mxu1 %v774_v15  ;;  %425 = vmatprep.mubr.bf16.mxu1 %v35_v41 }
  0x12   :  { %688 = vmatprep.subr.bf16.mxu1 %v777_v18 }
  0x13   :  { %667 = vmatpush3.bf16.msra.mxu0 %v776_v17 }
  0x14   :  { %668 = vmatprep.subr.bf16.mxu0 %v779_v20 }
  0x15   :  { %689 = vmatpush3.bf16.msra.mxu1 %v778_v19 }
  0x16   :  { %690 = vmatprep.subr.bf16.mxu1 %v781_v22 }
  0x17   :  { %669 = vmatpush3.bf16.msra.mxu0 %v780_v21 }
  0x18   :  { %670 = vmatprep.subr.bf16.mxu0 %v783_v24 }
  0x19   :  { %691 = vmatpush3.bf16.msra.mxu1 %v782_v23 }
  0x1a   :  { %692 = vmatprep.subr.bf16.mxu1 %v785_v26 }
  0x1b   :  { %671 = vmatpush3.bf16.msra.mxu0 %v784_v25 }
  0x1c   :  { %672 = vmatprep.subr.bf16.mxu0 %v787_v28 }
  0x1d   :  { %693 = vmatpush3.bf16.msra.mxu1 %v786_v27 }
  0x1e   :  { %694 = vmatprep.subr.bf16.mxu1 %v789_v30 }
  0x1f   :  { %673 = vmatpush3.bf16.msra.mxu0 %v788_v29 }
  0x20   :  { %718 = vmatprep.subr.bf16.mxu0 %v833_v36 }
  0x21   :  { %695 = vmatpush3.bf16.msra.mxu1 %v790_v34 }
  0x22   :  { %734 = vmatprep.subr.bf16.mxu1 %v833_v36  ;;  %385 = vmatmul.mubr.bf16.vlgmr.msra.gmra.mrb[0].mxu0 %v32_v40 }
  0x23   :  { %719 = vmatpush3.bf16.msra.mxu0 %v791_v42  ;;  %730 = vmatprep.mubr.msk.bf16.mxu0 %vm834_vm0, %v833_v36 }
  0x24   :  { %426 = vmatmul.mubr.bf16.vlgmr.msra.gmra.mrb[0].mxu1 %v34_v45  ;;  %720 = vmatprep.subr.bf16.mxu0 %v833_v36 }
  0x25   :  { %750 = vmatprep.mubr.msk.bf16.mxu1 %vm834_vm0, %v833_v36 }
  0x27   :  { %721 = vmatpush3.bf16.msra.mxu0 %v792_v46 }
  0x28   :  { %722 = vmatprep.subr.bf16.mxu0 %v833_v36 }
  0x2b   :  { %723 = vmatpush3.bf16.msra.mxu0 %v793_v47 }
  0x2c   :  { %724 = vmatprep.subr.bf16.mxu0 %v833_v36 }
  0x2d   :  { %10 = vsyncpa [#allocation3], 0  ;;  %v795_v49 = vld [vmem:[%s1071_s1 + $0x120] sm:$0xff]   ;;  %v796_v50 = vld [vmem:[%s1071_s1 + $0x128] ss:$0 sps:$4 sm:$0xff]   ;;  %vm348_vm1 = vcmask 1043456  }
  0x2e   :  { %v26_v51 = vld [vmem:[%s1070_s0 + $0x20] sm:$0xff]  ;;  %v31_v52 = vld [vmem:[%s1070_s0 + $0x48] sm:$0xff]  ;;  %v350_v53 = vsel %vm348_vm1, %v796_v50, 0  ;;  %vm344_vm2 = vcmask 719872   ;;  %v799_v57 = vld [vmem:[%s1073_s3 + $0x10] sm:$0xff]   ;;  %s835_s30 = smov [#allocation2]  }
  0x2f   :  { %725 = vmatpush3.bf16.msra.mxu0 %v794_v48  ;;  %v36_v54 = vpack.c.bf16 %v31_v52, %v26_v51  ;;  %v797_v55 = vld [vmem:[%s1073_s3] sm:$0xff]   ;;  %v798_v56 = vld [vmem:[%s1073_s3 + $0x8] sm:$0xff]   ;;  %v800_v58 = vld [vmem:[%s1073_s3 + $0x18] sm:$0xff]   ;;  %s598_s6 = sshll.u32 %s835_s30, 4  ;;  %vm590_vm3 = vcmask 818176   ;;  %s599_s6 = int_to_ptr.vmem [resolvable:$true] %s598_s6 }
  0x30   :  { %726 = vmatprep.subr.bf16.mxu0 %v833_v36  ;;  %735 = vmatpush3.bf16.msra.mxu1 %v797_v55  ;;  %v801_v59 = vld [vmem:[%s1073_s3 + $0x20] sm:$0xff]   ;;  %v802_v60 = vld [vmem:[%s1073_s3 + $0x28] sm:$0xff]   ;;  %v803_v61 = vld [vmem:[%s1073_s3 + $0x30] sm:$0xff]   ;;  %s809_s7 = scalar_lea.vmem %s599_s6, 256  ;;  %p814_p1 = scmp.lt.s32.totalorder %s599_s6, %s599_s6 }
  0x31   :  { %736 = vmatprep.subr.bf16.mxu1 %v833_v36  ;;  %v804_v62 = vld [vmem:[%s1073_s3 + $0x38] sm:$0xff]   ;;  %v609_v0 = vld [vmem:[%s1072_s2] ss:$0 sm:$0xff]  ;;  %p810_p0 = scmp.ne.s32.totalorder %s599_s6, %s809_s7  ;;  %p815_p2 = scmp.lt.s32.totalorder %s809_s7, %s809_s7 }
  0x32   :  { %v649_v25 = vld [vmem:[%s1074_s4] ss:$0 sm:$0xff] }
  0x33   :  { %727 = vmatpush3.bf16.msra.mxu0 %v795_v49  ;;  %p816_p3 = por %p815_p2, %p814_p1 }
  0x34   :  { %728 = vmatprep.subr.bf16.mxu0 %v833_v36  ;;  %737 = vmatpush3.bf16.msra.mxu1 %v798_v56 }
  0x35   :  { %738 = vmatprep.subr.bf16.mxu1 %v833_v36  ;;  %p817_p4 = pnand %p816_p3, %p810_p0 }
  0x37   :  { %729 = vmatpush3.bf16.msra.mxu0 %v350_v53 }
  0x38   :  { %739 = vmatpush3.bf16.msra.mxu1 %v799_v57 }
  0x39   :  { %740 = vmatprep.subr.bf16.mxu1 %v833_v36 }
  0x3a   :  { %731 = vmatmul.mubr.msk.bf16.vlgmr.msra.gmra.mrb[4].mxu0 %vm344_vm2, %v36_v54 }
  0x3c   :  { %741 = vmatpush3.bf16.msra.mxu1 %v800_v58 }
  0x3d   :  { %742 = vmatprep.subr.bf16.mxu1 %v833_v36 }
  0x40   :  { %743 = vmatpush3.bf16.msra.mxu1 %v801_v59 }
  0x41   :  { %744 = vmatprep.subr.bf16.mxu1 %v833_v36 }
  0x44   :  { %745 = vmatpush3.bf16.msra.mxu1 %v802_v60 }
  0x45   :  { %746 = vmatprep.subr.bf16.mxu1 %v833_v36 }
  0x48   :  { %747 = vmatpush3.bf16.msra.mxu1 %v803_v61 }
  0x49   :  { %748 = vmatprep.subr.bf16.mxu1 %v833_v36 }
  0x4c   :  { %749 = vmatpush3.bf16.msra.mxu1 %v804_v62 }
  0xf5   :  { %v674_v63 = vpop.f32.mrb[0].mxu0 }
  0xf6   :  { %v675_v1 = vpop.f32.mrb[1].mxu0 }
  0xf7   :  { %v676_v2 = vadd.f32 %v675_v1, %v674_v63  ;;  %v677_v3 = vpop.f32.mrb[2].mxu0  ;;  %v696_v4 = vpop.f32.mrb[0].mxu1 }
  0xf8   :  { %v678_v5 = vpop.f32.mrb[3].mxu0  ;;  %v697_v6 = vpop.f32.mrb[1].mxu1 }
  0xf9   :  { %v387_v7 = vadd.f32 %v676_v2, %v609_v0  ;;  %v679_v8 = vadd.f32 %v678_v5, %v677_v3  ;;  %v698_v9 = vadd.f32 %v697_v6, %v696_v4  ;;  %v699_v10 = vpop.f32.mrb[2].mxu1 }
  0xfa   :  { %v700_v11 = vpop.f32.mrb[3].mxu1 }
  0xfb   :  { %v390_v12 = vadd.f32 %v679_v8, %v609_v0  ;;  %v701_v13 = vadd.f32 %v700_v11, %v699_v10  ;;  %v428_v14 = vadd.f32 %v698_v9, %v387_v7 }
  0xfd   :  { %v431_v15 = vadd.f32 %v701_v13, %v390_v12 }
 0x10d   :  { %v468_v16 = vpop.f32.mrb[4].mxu0 }
 0x10e   :  { %v469_v17 = vadd.f32 %v468_v16, %v428_v14  ;;  %v732_v18 = vpop.f32.mrb[5].mxu0 }
 0x10f   :  { %v471_v19 = vpop.f32.mrb[6].mxu0 }
 0x110   :  { %v472_v20 = vadd.f32 %v471_v19, %v431_v15  ;;  %v733_v21 = vpop.f32.mrb[7].mxu0  ;;  %805 = vtanh.f32 %v469_v17 }
 0x112   :  { %807 = vtanh.f32 %v472_v20 }
 0x11a   :  { %v806_v22 = vpop.eup %805 }
 0x11c   :  { %v808_v23 = vpop.eup %807 }
 0x11d   :  { %v477_v24 = vpack.c.bf16 %v808_v23, %v806_v22 }
 0x11f   :  { %751 = vmatmul.mubr.bf16.vlgmr.msra.gmra.mrb[4].mxu1 %v477_v24 }
 0x1f2   :  { %v583_v26 = vpop.f32.mrb[4].mxu1 }
 0x1f3   :  { %v584_v27 = vadd.f32 %v649_v25, %v583_v26  ;;  %v752_v28 = vpop.f32.mrb[5].mxu1 }
 0x1f4   :  { %v586_v29 = vpop.f32.mrb[6].mxu1 }
 0x1f5   :  { %591 = vst.msk [vmem:[#allocation2] sm:$0xff] %vm590_vm3, %v584_v27  ;;  %v587_v30 = vadd.f32 %v649_v25, %v586_v29  ;;  %v753_v31 = vpop.f32.mrb[7].mxu1 }
 0x1f7   :  { %592 = vst.msk [vmem:[#allocation2 + $0x8] sm:$0xff] %vm590_vm3, %v587_v30 }
 0x1f8   :  { %820 = shalt.err (!%p817_p4)
}
 0x1f9   :  { %s821_s9 = scalar_lea.hbm %s1075_s5, 256 }
 0x1fa   :  { %p822_p5 = scmp.ne.s32.totalorder %s1075_s5, %s821_s9  ;;  %p825_p6 = scmp.lt.u32.totalorder %s821_s9, %s1075_s5 }
 0x1fc   :  { %p827_p7 = pnand %p825_p6, %p822_p5 }
 0x1fe   :  { %830 = shalt.err (!%p827_p7)
}
 0x1ff   :  { %s836_s14 = smov 128   ;;  %s837_s15 = smov 8  }
 0x200   :  { %604 = dma.vmem_to_hbm [thread:$0]  %s599_s6, 256, %s1075_s5, [#allocation3], %s836_s14, %s836_s14, %s837_s15  }
 0x201   :  { %831 = dma.done.wait [#allocation3], 256  }
 0x202   :  { %832 = vsyncadd [#allocation3], 4294967040 }
 0x203   :  { %608 = vsyncpa [#allocation3], 1 }

</bundles_post_ra>
